<compile_context>
chip_gen: v5e
topology: v5e:2x2
jax: 0.10.0
libtpu: 0.0.40
codegen_flags: <defaults>
</compile_context>

<pallas_src>
import functools

import jax
import jax.numpy as jnp
from jax.experimental import pallas as pl
from jax.experimental.pallas import tpu as pltpu

_NEG_INF = -1e30


def _round_up(x, m):
    return ((x + m - 1) // m) * m


# ----------------------------------------------------------------------------
# Kernel 1: hoisted feature transform  xw = x @ [W_1 | ... | W_R | W_root]
# ----------------------------------------------------------------------------
def _xw_kernel(x_ref, w_ref, o_ref):
    o_ref[...] = jnp.dot(
        x_ref[...], w_ref[...], preferred_element_type=jnp.float32
    ).astype(o_ref.dtype)


def _transform_features(x_bf16, w_stacked_bf16, *, tn):
    n_pad, fin = x_bf16.shape
    _, kout = w_stacked_bf16.shape
    return pl.pallas_call(
        _xw_kernel,
        out_shape=jax.ShapeDtypeStruct((n_pad, kout), jnp.bfloat16),
        grid_spec=pltpu.PrefetchScalarGridSpec(
            num_scalar_prefetch=0,
            grid=(n_pad // tn,),
            in_specs=[
                pl.BlockSpec((tn, fin), lambda i: (i, 0)),
                pl.BlockSpec((fin, kout), lambda i: (0, 0)),
            ],
            out_specs=pl.BlockSpec((tn, kout), lambda i: (i, 0)),
        ),
        compiler_params=pltpu.CompilerParams(
            dimension_semantics=("parallel",)),
    )(x_bf16, w_stacked_bf16)


# ----------------------------------------------------------------------------
# Kernel 2: relational SpMM  out[tile] = sum_r A_r[tile, :] @ xw_r  (+root/bias)
# ----------------------------------------------------------------------------
def _rgcn_spmm_kernel(xw_ref, a_ref, bias_ref, o_ref, *,
                      num_rel, fout_pad, tn, activation, head_dims):
    i = pl.program_id(0)
    r = pl.program_id(1)

    @pl.when(r == 0)
    def _init():
        # Root term + bias folded into the accumulator init.  The root columns
        # live in the resident xw slab (trailing fout_pad columns); the rows
        # for this dst tile are a 128-aligned dynamic sublane slice.
        row0 = pl.multiple_of(i * tn, 128)
        root = xw_ref[pl.ds(row0, tn),
                      pl.ds(num_rel * fout_pad, fout_pad)]
        o_ref[...] = root.astype(jnp.float32) + bias_ref[...]

    # Relation-r columns of the resident xw slab (lane-aligned dynamic slice).
    col = pl.multiple_of(r * fout_pad, 128)
    xw_r = xw_ref[:, pl.ds(col, fout_pad)]

    a = a_ref[...]
    if a.dtype != jnp.bfloat16:
        # int8 adjacency (edge multiplicities): dequantize in-VMEM so HBM only
        # ever sees 1 byte/entry; the MXU still runs the bf16 path on all gens.
        a = a.astype(jnp.float32).astype(jnp.bfloat16)

    # bf16 operands, f32 accumulation directly into the resident output block.
    o_ref[...] += jnp.dot(a, xw_r, preferred_element_type=jnp.float32)

    @pl.when(r == pl.num_programs(1) - 1)
    def _finalize():
        out = o_ref[...]
        if activation == "relu":
            out = jnp.maximum(out, 0.0)
        elif activation == "log_softmax":
            # Fused task heads: segment-masked log_softmax per head so all
            # heads share a single adjacency pass.
            lane = jax.lax.broadcasted_iota(jnp.int32, out.shape, 1)
            res = jnp.zeros_like(out)
            off = 0
            for d in head_dims:
                mask = (lane >= off) & (lane < off + d)
                seg = jnp.where(mask, out, _NEG_INF)
                m = jnp.max(seg, axis=-1, keepdims=True)
                p = jnp.where(mask, jnp.exp(seg - m), 0.0)
                lse = m + jnp.log(jnp.sum(p, axis=-1, keepdims=True))
                res = jnp.where(mask, seg - lse, res)
                off += d
            out = res
        o_ref[...] = out


def rgcn_layer(x_pad, w_rel, adj, root, bias, activation, *, tn, head_dims=()):
    """One RGCN layer.

    x_pad: [N_pad, Fin]   (rows padded to a multiple of tn; N_pad % 128 == 0)
    w_rel: [R, Fin, Fout] basis-combined relation weights (float32)
    adj:   [R, N_pad, N_pad] dense per-relation adjacency (dst, src); int8 or bf16
    root:  [Fin, Fout];  bias: [Fout]
    Returns [N_pad, Fout] float32.
    """
    n_pad, fin = x_pad.shape
    num_rel, _, fout = w_rel.shape
    fout_pad = _round_up(fout, 128)
    pad_cols = fout_pad - fout

    # Lane-dense (multiple-of-128) output width: zero-pad the weight columns.
    w_rel_p = jnp.pad(w_rel, ((0, 0), (0, 0), (0, pad_cols)))
    root_p = jnp.pad(root, ((0, 0), (0, pad_cols)))
    bias_p = jnp.pad(bias, ((0, pad_cols),)).reshape(1, fout_pad).astype(jnp.float32)

    # Stack all relation weights + root into one [Fin, (R+1)*Fout_pad] matrix so
    # the skinny x @ W transforms become a single well-shaped MXU matmul.
    w_stacked = jnp.concatenate(
        [w_rel_p.transpose(1, 0, 2).reshape(fin, num_rel * fout_pad), root_p],
        axis=1).astype(jnp.bfloat16)

    xw_all = _transform_features(x_pad.astype(jnp.bfloat16), w_stacked, tn=tn)
    kw = (num_rel + 1) * fout_pad  # total xw slab width

    kernel = functools.partial(
        _rgcn_spmm_kernel, num_rel=num_rel, fout_pad=fout_pad, tn=tn,
        activation=activation, head_dims=tuple(head_dims))

    adj_bytes = jnp.dtype(adj.dtype).itemsize
    flops = 2 * num_rel * n_pad * n_pad * fout_pad
    bytes_accessed = (num_rel * n_pad * n_pad * adj_bytes  # adjacency stream
                      + n_pad * kw * 2                      # xw slab (read once)
                      + n_pad * fout_pad * 4                # output (f32)
                      + fout_pad * 4)                       # bias
    transcendentals = n_pad * fout_pad if activation == "log_softmax" else 0

    # VMEM budget: resident xw slab + double-buffered A tile / output / bias.
    vm_bytes = (2 * n_pad * kw * 2             # resident xw (conservatively x2)
                + 2 * tn * n_pad * adj_bytes   # A_r dst-row tile
                + 2 * fout_pad * 4             # bias
                + 2 * tn * fout_pad * 4)       # resident output tile
    vmem_limit = int(min(56 * 1024 * 1024,
                         max(8 * 1024 * 1024, vm_bytes + (2 << 20))))

    out = pl.pallas_call(
        kernel,
        out_shape=jax.ShapeDtypeStruct((n_pad, fout_pad), jnp.float32),
        grid_spec=pltpu.PrefetchScalarGridSpec(
            num_scalar_prefetch=0,
            grid=(n_pad // tn, num_rel),
            in_specs=[
                # Resident xw slab: constant block index => DMA'd once, never
                # re-fetched across the whole grid.
                pl.BlockSpec((n_pad, kw), lambda i, r: (0, 0)),
                # A_r dst-row tile: the streamed (dominant) HBM operand.
                pl.BlockSpec((None, tn, n_pad), lambda i, r: (r, i, 0)),
                # bias (constant)
                pl.BlockSpec((1, fout_pad), lambda i, r: (0, 0)),
            ],
            out_specs=pl.BlockSpec((tn, fout_pad), lambda i, r: (i, 0)),
        ),
        compiler_params=pltpu.CompilerParams(
            dimension_semantics=("parallel", "arbitrary"),
            vmem_limit_bytes=vmem_limit),
        cost_estimate=pl.CostEstimate(flops=int(flops),
                                      transcendentals=int(transcendentals),
                                      bytes_accessed=int(bytes_accessed)),
    )(xw_all, adj, bias_p)

    return out[:, :fout]


# ----------------------------------------------------------------------------
# Pure-JAX reference (same bf16-operand / f32-accumulation pipeline)
# ----------------------------------------------------------------------------
def rgcn_layer_ref(x, w_rel, adj, root, bias, activation):
    adj_bf = adj.astype(jnp.bfloat16)
    x_bf = x.astype(jnp.bfloat16)
    xw = jnp.einsum("nf,rfo->rno", x_bf, w_rel.astype(jnp.bfloat16),
                    preferred_element_type=jnp.float32).astype(jnp.bfloat16)
    agg = jnp.einsum("rds,rso->do", adj_bf, xw,
                     preferred_element_type=jnp.float32)
    root_term = jnp.dot(x_bf, root.astype(jnp.bfloat16),
                        preferred_element_type=jnp.float32)
    root_term = root_term.astype(jnp.bfloat16).astype(jnp.float32)
    out = agg + root_term + bias.astype(jnp.float32)
    if activation == "relu":
        out = jnp.maximum(out, 0.0)
    elif activation == "log_softmax":
        out = jax.nn.log_softmax(out, axis=-1)
    return out


# ----------------------------------------------------------------------------
# Parameter construction (mirrors RGCNConv basis decomposition)
# ----------------------------------------------------------------------------
def init_rgcn_params(key, in_ch, out_ch, num_relations, num_bases):
    k1, k2, k3, k4 = jax.random.split(key, 4)
    scale = 1.0 / jnp.sqrt(jnp.float32(in_ch))
    basis = jax.random.normal(k1, (num_bases, in_ch, out_ch), jnp.float32) * scale
    comp = jax.random.normal(k2, (num_relations, num_bases), jnp.float32)
    root = jax.random.normal(k3, (in_ch, out_ch), jnp.float32) * scale
    bias = jax.random.normal(k4, (out_ch,), jnp.float32) * 0.01
    return {"basis": basis, "comp": comp, "root": root, "bias": bias}


def combined_weights(params):
    # W_r = sum_b comp[r, b] * basis[b]   -> [R, Fin, Fout]
    return jnp.einsum("rb,bio->rio", params["comp"], params["basis"])


def build_adjacency(edge_index, edge_type, num_nodes, num_relations,
                    edge_norm=None):
    """Dense per-relation adjacency A[r, dst, src] (sum aggregation).

    Stored as int8 edge multiplicities when edge_norm is None: the SpMM is
    HBM-bandwidth bound on v5e/v6e/v7x, so halving (vs bf16) the dominant
    adjacency stream is the cheapest big win; the kernel dequantizes to bf16
    before the MXU so the same storage works on all generations (v7x has no
    integer MXU).  bf16 storage is used when edge_norm carries real weights.
    """
    src = edge_index[0]
    dst = edge_index[1]
    if edge_norm is None:
        vals = jnp.ones(src.shape, jnp.float32)
    else:
        vals = edge_norm.astype(jnp.float32)
    adj = jnp.zeros((num_relations, num_nodes, num_nodes), jnp.float32)
    adj = adj.at[edge_type, dst, src].add(vals)
    if edge_norm is None:
        # Edge multiplicities are exact in int8 up to 127 parallel edges.
        adj = jnp.clip(adj, -127.0, 127.0).astype(jnp.int8)
    else:
        adj = adj.astype(jnp.bfloat16)
    return adj


# ----------------------------------------------------------------------------
# GIANTNet forward (emb_mats=None path: total_emb_size == 0)
# ----------------------------------------------------------------------------
class GIANTNetPallas:
    def __init__(self, key, *, layers, in_channels, out_channels,
                 num_relations, num_bases, task_output_dims, tile_rows=256):
        assert layers >= 2
        self.layers = layers
        self.num_relations = num_relations
        self.task_output_dims = list(task_output_dims)
        self.tile_rows = tile_rows

        keys = jax.random.split(key, layers + len(task_output_dims))
        ki = 0
        self.gcn_in = init_rgcn_params(keys[ki], in_channels, out_channels,
                                       num_relations, num_bases); ki += 1
        self.gcns_internal = []
        for _ in range(layers - 2):
            self.gcns_internal.append(
                init_rgcn_params(keys[ki], out_channels, out_channels,
                                 num_relations, num_bases)); ki += 1
        self.gcns_out = []
        for out_dim in task_output_dims:
            self.gcns_out.append(
                init_rgcn_params(keys[ki], out_channels, out_dim,
                                 num_relations, num_bases)); ki += 1

    def _tiling(self, n):
        # Always lane/sublane aligned node padding (SpMM K is a multiple of 128).
        n_pad = _round_up(max(n, 1), 128)
        # 256-row dst tiles better fill the 2x256x256 MXU on v6e/v7x and halve
        # grid-step overhead; fall back to 128 when that would leave <2 tiles
        # (keeps the 'parallel' axis splittable across TensorCores).
        tn = 256 if (self.tile_rows >= 256 and n_pad % 256 == 0
                     and n_pad // 256 >= 2) else 128
        n_pad = _round_up(n_pad, tn)
        return n_pad, tn

    def __call__(self, x, edge_index, edge_type, edge_norm=None):
        # TODO(synk): Embedder / emb_ids_dict path not implemented (emb_mats=None).
        x = jnp.squeeze(x, axis=0).astype(jnp.float32)
        n = x.shape[0]
        n_pad, tn = self._tiling(n)
        x = jnp.pad(x, ((0, n_pad - n), (0, 0)))
        adj = build_adjacency(edge_index, edge_type, n_pad,
                              self.num_relations, edge_norm)

        # TODO(synk): F.dropout is identity here (inference mode).
        p = self.gcn_in
        x = rgcn_layer(x, combined_weights(p), adj, p["root"], p["bias"],
                       activation="relu", tn=tn)
        for p in self.gcns_internal:
            x = rgcn_layer(x, combined_weights(p), adj, p["root"], p["bias"],
                           activation="relu", tn=tn)

        # Fused task heads: one adjacency pass for all heads (column-concatenated
        # weights); per-head log_softmax is segment-masked in the epilogue.
        w_heads = jnp.concatenate(
            [combined_weights(p) for p in self.gcns_out], axis=-1)
        root_heads = jnp.concatenate([p["root"] for p in self.gcns_out], axis=-1)
        bias_heads = jnp.concatenate([p["bias"] for p in self.gcns_out], axis=-1)
        fused = rgcn_layer(x, w_heads, adj, root_heads, bias_heads,
                           activation="log_softmax", tn=tn,
                           head_dims=self.task_output_dims)

        outputs = []
        off = 0
        for d in self.task_output_dims:
            outputs.append(fused[:n, off:off + d])
            off += d
        return outputs

    def reference(self, x, edge_index, edge_type, edge_norm=None):
        x = jnp.squeeze(x, axis=0).astype(jnp.float32)
        n = x.shape[0]
        adj = build_adjacency(edge_index, edge_type, n, self.num_relations,
                              edge_norm)
        p = self.gcn_in
        x = rgcn_layer_ref(x, combined_weights(p), adj, p["root"], p["bias"],
                           "relu")
        for p in self.gcns_internal:
            x = rgcn_layer_ref(x, combined_weights(p), adj, p["root"],
                               p["bias"], "relu")
        return [rgcn_layer_ref(x, combined_weights(p), adj, p["root"],
                               p["bias"], "log_softmax")
                for p in self.gcns_out]


if __name__ == "__main__":
    key = jax.random.PRNGKey(0)
    k_param, k_x, k_src, k_dst, k_rel = jax.random.split(key, 5)

    # Small synthetic graph; N=512 exercises the tn=256 path with 2 dst tiles
    # (even, >=2, so the 'parallel' axis can split across TensorCores).
    N = 512              # number of nodes
    IN_CH = 16           # input feature dim
    OUT_CH = 128         # hidden dim (multiple of 128 -> lane dense)
    NUM_REL = 3          # relation types
    NUM_BASES = 2
    LAYERS = 3
    TASK_DIMS = [8, 16]  # task heads (fused; padded together to 128 lanes)
    E = 1024             # number of edges

    x = jax.random.normal(k_x, (1, N, IN_CH), jnp.float32)
    edge_src = jax.random.randint(k_src, (E,), 0, N)
    edge_dst = jax.random.randint(k_dst, (E,), 0, N)
    edge_index = jnp.stack([edge_src, edge_dst], axis=0)   # [2, E]
    edge_type = jax.random.randint(k_rel, (E,), 0, NUM_REL)

    model = GIANTNetPallas(
        k_param, layers=LAYERS, in_channels=IN_CH, out_channels=OUT_CH,
        num_relations=NUM_REL, num_bases=NUM_BASES,
        task_output_dims=TASK_DIMS)

    outputs = model(x, edge_index, edge_type, edge_norm=None)
    for o in outputs:
        jax.block_until_ready(o)

    # Correctness checks against the pure-JAX reference.
    refs = model.reference(x, edge_index, edge_type, edge_norm=None)
    for o, r, d in zip(outputs, refs, TASK_DIMS):
        assert o.shape == (N, d), o.shape
        # log_softmax rows should sum (in prob space) to ~1
        row_sums = jnp.sum(jnp.exp(o), axis=1)
        assert jnp.allclose(row_sums, 1.0, atol=1e-4), row_sums
        assert jnp.allclose(o, r, atol=2e-2, rtol=2e-2), \
            float(jnp.max(jnp.abs(o - r)))

    print("KERNEL_OK")
</pallas_src>

<mosaic_0001>
module attributes {stable_mosaic.version = 11 : i64} {
  func.func @_xw_kernel(%arg0: i32, %arg1: memref<256x16xbf16, #tpu.memory_space<vmem>>, %arg2: memref<16x512xbf16, #tpu.memory_space<vmem>>, %arg3: memref<256x512xbf16, #tpu.memory_space<vmem>>) attributes {dimension_semantics = [#tpu.dimension_semantics<parallel>], iteration_bounds = array<i64: 2>, scalar_prefetch = 0 : i64, scratch_operands = 0 : i64, tpu.core_type = #tpu.core_type<tc>, window_params = [{transform_indices = @transform_0, window_bounds = array<i64: 256, 16>}, {pipeline_mode = #tpu.pipeline_mode<synchronous>, transform_indices = @transform_1, window_bounds = array<i64: 16, 512>}, {transform_indices = @transform_2, window_bounds = array<i64: 256, 512>}]} {
    %c0 = arith.constant 0 : index
    %c0_0 = arith.constant 0 : index
    %0 = vector.load %arg1[%c0, %c0_0] : memref<256x16xbf16, #tpu.memory_space<vmem>>, vector<256x16xbf16>
    %c0_1 = arith.constant 0 : index
    %c0_2 = arith.constant 0 : index
    %1 = vector.load %arg2[%c0_1, %c0_2] : memref<16x512xbf16, #tpu.memory_space<vmem>>, vector<16x512xbf16>
    %cst = arith.constant dense<0.000000e+00> : vector<256x512xf32>
    %2 = tpu.matmul %0, %1, %cst {dimension_numbers = #tpu.dot_dimension_numbers<[1], [0], [0], [1], [0, 0, 1, 1], [], []>} : vector<256x16xbf16>, vector<16x512xbf16>, vector<256x512xf32> -> vector<256x512xf32>
    %3 = arith.truncf %2 : vector<256x512xf32> to vector<256x512xbf16>
    %c0_3 = arith.constant 0 : index
    %c0_4 = arith.constant 0 : index
    %4 = vector.load %arg3[%c0_3, %c0_4] : memref<256x512xbf16, #tpu.memory_space<vmem>>, vector<256x512xbf16>
    tpu.vector_store %arg3[%c0_3, %c0_4], %3 {strides = array<i32>} : memref<256x512xbf16, #tpu.memory_space<vmem>>, vector<256x512xbf16>,
    return
  }
  func.func @transform_0(%arg0: i32) -> (i32, i32) {
    %c0_i32 = arith.constant 0 : i32
    %c0_i32_0 = arith.constant 0 : i32
    return %arg0, %c0_i32 : i32, i32
  }
  func.func @transform_1(%arg0: i32) -> (i32, i32) {
    %c0_i32 = arith.constant 0 : i32
    %c0_i32_0 = arith.constant 0 : i32
    %c0_i32_1 = arith.constant 0 : i32
    return %c0_i32, %c0_i32_0 : i32, i32
  }
  func.func @transform_2(%arg0: i32) -> (i32, i32) {
    %c0_i32 = arith.constant 0 : i32
    %c0_i32_0 = arith.constant 0 : i32
    return %arg0, %c0_i32 : i32, i32
  }
}

</mosaic_0001>

<bundles_post_ra>
// kernel: tpu_custom_call.1
= control target key start
LH: loop header
LB: loop body
LE: loop exit
PB: predicated region body
PF: predicated region fallthrough
CT: control target
= control target key end

     0   :  { %7 = vsyncpa [#allocation3], 0  ;;  %s1456_s0 = inlined_call_operand.vmem [shape: bf16[512,16], index: 0, kind: input, shape index: {}]   ;;  %s1457_s1 = inlined_call_operand.vmem [shape: bf16[16,512], index: 1, kind: input, shape index: {}]   ;;  %s1458_s2 = inlined_call_operand.hbm [shape: bf16[512,512], index: 2, kind: output, shape index: {}]  }
   0x1   :  { %9 = vsyncpa [#allocation3 + $0x1], 0  ;;  %s1195_s9 = smov 0   ;;  %s1197_s10 = smov 0  }
   0x2   :  { %s1199_s11 = smov 0   ;;  %s1201_s12 = smov 0  }
   0x3 LB: > { %s1216_s13 = sadd.s32 4294967295, %s1176_s12   ;;  %s894_s14 = sadd.s32 4294967294, %s1176_s12   ;;  %s1176_s12 = sphi %s1201_s12, %s1464_s12   ;;  %s1172_s11 = sphi %s1199_s11, %s1463_s11   ;;  %s1168_s10 = sphi %s1197_s10, %s1462_s10   ;;  %s1164_s9 = sphi %s1195_s9, %s1461_s9  }
   0x4   : > { %s1220_s15 = sadd.s32 1, %s1176_s12   ;;  %s69_s16 = sadd.s32 1, %s1172_s11 }
   0x5   : > { %s66_s17 = ssub.s32 %s1176_s12, %s1220_s15  ;;  %p79_p0 = scmp.ne.s32.totalorder %s1172_s11, %s1168_s10 }
   0x6   : > { %p67_p1 = scmp.eq.s32.totalorder %s66_s17, 0  ;;  %p80_p2 = scmp.eq.s32.totalorder %s1216_s13, 1 }
   0x7   : > { %p85_p3 = scmp.ne.s32.totalorder %s1168_s10, %s1164_s9  ;;  %p86_p4 = scmp.eq.s32.totalorder %s894_s14, 1 }
   0x8   : > { %s1231_s18 = scalar_select %p67_p1, %s1172_s11, %s69_s16  }
   0x9   : > { %p1233_p5 = por %p80_p2, %p79_p0  ;;  %p1237_p6 = por %p86_p4, %p85_p3 }
   0xa   : > { %p897_p7 = scmp.ge.s32.totalorder %s1176_s12, 1  ;;  %p116_p8 = scmp.lt.s32.totalorder %s1176_s12, 3 }
   0xc   : > { %p117_p9 = pnand %p897_p7, %p116_p8 }
   0xd   : > { %s899_s14 = sshll.u32 (!%p117_p9), %s1216_s13, 5  ;;  %s135_s23 = sand.u32 (!%p117_p9), 1, %s1168_s10  }
   0xe   : > { %120 = sbr.rel (%p117_p9) target bundleno = 413 (0x19d), region = 28  ;;  %p139_p10 = scmp.lt.s32.totalorder (!%p117_p9), %s899_s14, 63 }
   0xf   : > { %s898_s24 = sshll.u32 (!%p117_p9), %s135_s23, 9  ;;  %s1072_s26 = sshll.u32 (!%p117_p9), %s1216_s13, 9 }
  0x10   : > { %s1317_s25 = scalar_lea.vmem (!%p117_p9), [#allocation2], %s898_s24  ;;  %s828_s29 = scalar_lea.hbm (!%p117_p9), %s1458_s2, %s1072_s26 }
  0x11   : > { %s829_s30 = sshll.u32 (!%p117_p9), %s1317_s25, 4  ;;  %s831_s3 = sshll.u32 (!%p117_p9), %s828_s29, 4  ;;  %s830_s30 = int_to_ptr.vmem [resolvable:$true] %s829_s30  ;;  %s832_s3 = int_to_ptr.hbm [resolvable:$true] %s831_s3 }
  0x12   : > { %s816_s13 = scalar_lea.sflag (!%p117_p9), [#allocation3], %s135_s23  ;;  %s1128_s4 = sshra.s32 (!%p117_p9), %s832_s3, 4  ;;  %s1129_s4 = int_to_ptr.hbm [resolvable:$true] %s1128_s4 }
  0x13   : > { %v967_v0 = vld [vmem:[%s1457_s1] sm:$0xf]  ;;  %v1069_v1 = vld [vmem:[%s1457_s1 + $0xc] sm:$0xf0]  ;;  %v1067_v2 = vld [vmem:[%s1457_s1 + $0x4] sm:$0xf]  ;;  %p1135_p0 = scmp.lt.s32.totalorder %s1129_s4, %s1458_s2 }
  0x14   : > { %v968_v3 = vor.u32 %v1069_v1, %v967_v0  ;;  %v969_v4 = vld [vmem:[%s1457_s1 + $0x10] sm:$0xf0]  ;;  %v975_v5 = vld [vmem:[%s1457_s1 + $0x8] sm:$0xf]  ;;  %v1070_v6 = vld [vmem:[%s1457_s1 + $0x14] sm:$0xf0] }
  0x15   : > { %v972_v7 = vor.u32 %v1067_v2, %v969_v4  ;;  %v976_v8 = vor.u32 %v1070_v6, %v975_v5  ;;  %v1068_v9 = vld [vmem:[%s1457_s1 + $0xc] sm:$0xf]  ;;  %v977_v10 = vld [vmem:[%s1457_s1 + $0x18] sm:$0xf0]  ;;  %s1466_s14 = smov (!%p139_p10, %s899_s14), 63  ;;  %vm282_vm0 = vcmask 130048  }
  0x16   : > { %338 = vmatpush.bf16.msra.mxu0 %v968_v3  ;;  %v980_v11 = vor.u32 %v1068_v9, %v977_v10  ;;  %s900_s16 = sshll.u32 %s1466_s14, 2  ;;  %s1130_s5 = scalar_lea.hbm %s1129_s4, 512 }
  0x17   : > { %427 = vmatpush.bf16.msra.mxu1 %v972_v7  ;;  %516 = vmatpush.bf16.msra.mxu2 %v976_v8  ;;  %s1271_s22 = scalar_lea.vmem %s1456_s0, %s900_s16  ;;  %p1131_p11 = scmp.ne.s32.totalorder %s1129_s4, %s1130_s5 }
  0x18   : > { %605 = vmatpush.bf16.msra.mxu3 %v980_v11  ;;  %v1051_v12 = vld [vmem:[%s1271_s22] sm:$0xff]  ;;  %v1052_v13 = vld [vmem:[%s1271_s22 + $0x8] sm:$0xff]  ;;  %v1053_v14 = vld [vmem:[%s1271_s22 + $0x10] sm:$0xff]  ;;  %s1134_s8 = scalar_lea.hbm %s1458_s2, 1024 }
  0x19   : > { %981 = vmatmul.msk.bf16.vlgmr.msra.gmra.mxu0 %vm282_vm0, %v1051_v12  ;;  %v1054_v15 = vld [vmem:[%s1271_s22 + $0x18] sm:$0xff]  ;;  %v1055_v16 = vld [vmem:[%s1271_s22 + $0x20] sm:$0xff]  ;;  %v1056_v17 = vld [vmem:[%s1271_s22 + $0x28] sm:$0xff]  ;;  %p1132_p12 = pnand %p1131_p11, %p1233_p5  ;;  %p1136_p1 = scmp.lt.s32.totalorder %s1134_s8, %s1130_s5 }
  0x1a   : > { %997 = vmatmul.msk.bf16.vlgmr.msra.gmra.mxu1 %vm282_vm0, %v1051_v12  ;;  %1013 = vmatmul.msk.bf16.vlgmr.msra.gmra.mxu2 %vm282_vm0, %v1051_v12  ;;  %v1057_v18 = vld [vmem:[%s1271_s22 + $0x30] sm:$0xff]  ;;  %v1058_v19 = vld [vmem:[%s1271_s22 + $0x38] sm:$0xff]  ;;  %v1059_v20 = vld [vmem:[%s1271_s22 + $0x40] sm:$0xff] }
  0x1b   : > { %1029 = vmatmul.msk.bf16.vlgmr.msra.gmra.mxu3 %vm282_vm0, %v1051_v12  ;;  %v1060_v32 = vld [vmem:[%s1271_s22 + $0x48] sm:$0xff]  ;;  %v1061_v45 = vld [vmem:[%s1271_s22 + $0x50] sm:$0xff]  ;;  %v1062_v58 = vld [vmem:[%s1271_s22 + $0x58] sm:$0xff]  ;;  %p1133_p13 = pneg %p1132_p12  ;;  %p1137_p2 = por %p1136_p1, %p1135_p0 }
  0x1c   : > { %v1063_v7 = vld [vmem:[%s1271_s22 + $0x60] sm:$0xff] }
  0x1d   : > { %p1138_p3 = pnand %p1137_p2, %p1133_p13 }
  0x29   : > { %982 = vmatmul.msk.bf16.gmra.mxu0 %vm282_vm0, %v1052_v13 }
  0x2a   : > { %998 = vmatmul.msk.bf16.gmra.mxu1 %vm282_vm0, %v1052_v13  ;;  %1014 = vmatmul.msk.bf16.gmra.mxu2 %vm282_vm0, %v1052_v13 }
  0x2b   : > { %1030 = vmatmul.msk.bf16.gmra.mxu3 %vm282_vm0, %v1052_v13 }
  0x39   : > { %983 = vmatmul.msk.bf16.gmra.mxu0 %vm282_vm0, %v1053_v14 }
  0x3a   : > { %999 = vmatmul.msk.bf16.gmra.mxu1 %vm282_vm0, %v1053_v14  ;;  %1015 = vmatmul.msk.bf16.gmra.mxu2 %vm282_vm0, %v1053_v14 }
  0x3b   : > { %1031 = vmatmul.msk.bf16.gmra.mxu3 %vm282_vm0, %v1053_v14 }
  0x49   : > { %984 = vmatmul.msk.bf16.gmra.mxu0 %vm282_vm0, %v1054_v15 }
  0x4a   : > { %1000 = vmatmul.msk.bf16.gmra.mxu1 %vm282_vm0, %v1054_v15  ;;  %1016 = vmatmul.msk.bf16.gmra.mxu2 %vm282_vm0, %v1054_v15 }
  0x4b   : > { %1032 = vmatmul.msk.bf16.gmra.mxu3 %vm282_vm0, %v1054_v15 }
  0x59   : > { %985 = vmatmul.msk.bf16.gmra.mxu0 %vm282_vm0, %v1055_v16 }
  0x5a   : > { %1001 = vmatmul.msk.bf16.gmra.mxu1 %vm282_vm0, %v1055_v16  ;;  %1017 = vmatmul.msk.bf16.gmra.mxu2 %vm282_vm0, %v1055_v16 }
  0x5b   : > { %1033 = vmatmul.msk.bf16.gmra.mxu3 %vm282_vm0, %v1055_v16 }
  0x69   : > { %986 = vmatmul.msk.bf16.gmra.mxu0 %vm282_vm0, %v1056_v17 }
  0x6a   : > { %1002 = vmatmul.msk.bf16.gmra.mxu1 %vm282_vm0, %v1056_v17  ;;  %1018 = vmatmul.msk.bf16.gmra.mxu2 %vm282_vm0, %v1056_v17 }
  0x6b   : > { %1034 = vmatmul.msk.bf16.gmra.mxu3 %vm282_vm0, %v1056_v17 }
  0x79   : > { %987 = vmatmul.msk.bf16.gmra.mxu0 %vm282_vm0, %v1057_v18 }
  0x7a   : > { %1003 = vmatmul.msk.bf16.gmra.mxu1 %vm282_vm0, %v1057_v18  ;;  %1019 = vmatmul.msk.bf16.gmra.mxu2 %vm282_vm0, %v1057_v18 }
  0x7b   : > { %1035 = vmatmul.msk.bf16.gmra.mxu3 %vm282_vm0, %v1057_v18 }
  0x89   : > { %988 = vmatmul.msk.bf16.gmra.mxu0 %vm282_vm0, %v1058_v19 }
  0x8a   : > { %1004 = vmatmul.msk.bf16.gmra.mxu1 %vm282_vm0, %v1058_v19  ;;  %1020 = vmatmul.msk.bf16.gmra.mxu2 %vm282_vm0, %v1058_v19 }
  0x8b   : > { %1036 = vmatmul.msk.bf16.gmra.mxu3 %vm282_vm0, %v1058_v19 }
  0x96   : > { %v340_v21 = vpop.f32.mrf.mxu0 }
  0x97   : > { %v429_v22 = vpop.f32.mrf.mxu1 }
  0x98   : > { %v687_v23 = vpack.c.bf16 %v429_v22, %v340_v21 }
  0x99   : > { %989 = vmatmul.msk.bf16.gmra.mxu0 %vm282_vm0, %v1059_v20 }
  0x9a   : > { %751 = vst [vmem:[%s1317_s25] sm:$0xff] %v687_v23  ;;  %1005 = vmatmul.msk.bf16.gmra.mxu1 %vm282_vm0, %v1059_v20  ;;  %1021 = vmatmul.msk.bf16.gmra.mxu2 %vm282_vm0, %v1059_v20 }
  0x9b   : > { %1037 = vmatmul.msk.bf16.gmra.mxu3 %vm282_vm0, %v1059_v20  ;;  %v1064_v20 = vld [vmem:[%s1271_s22 + $0x68] sm:$0xff] }
  0x9d   : > { %v518_v24 = vpop.f32.mrf.mxu2 }
  0x9e   : > { %v607_v25 = vpop.f32.mrf.mxu3  ;;  %v342_v27 = vpop.f32.mrf.mxu0 }
  0x9f   : > { %v688_v26 = vpack.c.bf16 %v607_v25, %v518_v24  ;;  %v431_v28 = vpop.f32.mrf.mxu1 }
  0xa0   : > { %v689_v29 = vpack.c.bf16 %v431_v28, %v342_v27 }
  0xa1   : > { %752 = vst [vmem:[%s1317_s25 + $0x8] sm:$0xff] %v688_v26 }
  0xa2   : > { %753 = vst [vmem:[%s1317_s25 + $0x10] sm:$0xff] %v689_v29 }
  0xa5   : > { %v520_v30 = vpop.f32.mrf.mxu2 }
  0xa6   : > { %v609_v31 = vpop.f32.mrf.mxu3  ;;  %v345_v34 = vpop.f32.mrf.mxu0 }
  0xa7   : > { %v690_v33 = vpack.c.bf16 %v609_v31, %v520_v30  ;;  %v434_v35 = vpop.f32.mrf.mxu1 }
  0xa8   : > { %v691_v36 = vpack.c.bf16 %v434_v35, %v345_v34 }
  0xa9   : > { %754 = vst [vmem:[%s1317_s25 + $0x18] sm:$0xff] %v690_v33  ;;  %990 = vmatmul.msk.bf16.gmra.mxu0 %vm282_vm0, %v1060_v32  ;;  %v1065_v33 = vld [vmem:[%s1271_s22 + $0x70] sm:$0xff] }
  0xaa   : > { %755 = vst [vmem:[%s1317_s25 + $0x20] sm:$0xff] %v691_v36  ;;  %1006 = vmatmul.msk.bf16.gmra.mxu1 %vm282_vm0, %v1060_v32  ;;  %1022 = vmatmul.msk.bf16.gmra.mxu2 %vm282_vm0, %v1060_v32 }
  0xab   : > { %1038 = vmatmul.msk.bf16.gmra.mxu3 %vm282_vm0, %v1060_v32 }
  0xad   : > { %v523_v37 = vpop.f32.mrf.mxu2 }
  0xae   : > { %v612_v38 = vpop.f32.mrf.mxu3  ;;  %v347_v40 = vpop.f32.mrf.mxu0 }
  0xaf   : > { %v692_v39 = vpack.c.bf16 %v612_v38, %v523_v37  ;;  %v436_v41 = vpop.f32.mrf.mxu1 }
  0xb0   : > { %v693_v42 = vpack.c.bf16 %v436_v41, %v347_v40 }
  0xb1   : > { %756 = vst [vmem:[%s1317_s25 + $0x28] sm:$0xff] %v692_v39 }
  0xb2   : > { %757 = vst [vmem:[%s1317_s25 + $0x30] sm:$0xff] %v693_v42 }
  0xb5   : > { %v525_v43 = vpop.f32.mrf.mxu2 }
  0xb6   : > { %v614_v44 = vpop.f32.mrf.mxu3  ;;  %v350_v47 = vpop.f32.mrf.mxu0 }
  0xb7   : > { %v694_v46 = vpack.c.bf16 %v614_v44, %v525_v43  ;;  %v439_v48 = vpop.f32.mrf.mxu1 }
  0xb8   : > { %v695_v49 = vpack.c.bf16 %v439_v48, %v350_v47 }
  0xb9   : > { %758 = vst [vmem:[%s1317_s25 + $0x38] sm:$0xff] %v694_v46  ;;  %991 = vmatmul.msk.bf16.gmra.mxu0 %vm282_vm0, %v1061_v45  ;;  %v1066_v46 = vld [vmem:[%s1271_s22 + $0x78] sm:$0xff] }
  0xba   : > { %759 = vst [vmem:[%s1317_s25 + $0x40] sm:$0xff] %v695_v49  ;;  %1007 = vmatmul.msk.bf16.gmra.mxu1 %vm282_vm0, %v1061_v45  ;;  %1023 = vmatmul.msk.bf16.gmra.mxu2 %vm282_vm0, %v1061_v45 }
  0xbb   : > { %1039 = vmatmul.msk.bf16.gmra.mxu3 %vm282_vm0, %v1061_v45 }
  0xbd   : > { %v528_v50 = vpop.f32.mrf.mxu2 }
  0xbe   : > { %v617_v51 = vpop.f32.mrf.mxu3  ;;  %v352_v53 = vpop.f32.mrf.mxu0 }
  0xbf   : > { %v696_v52 = vpack.c.bf16 %v617_v51, %v528_v50  ;;  %v441_v54 = vpop.f32.mrf.mxu1 }
  0xc0   : > { %v697_v55 = vpack.c.bf16 %v441_v54, %v352_v53 }
  0xc1   : > { %760 = vst [vmem:[%s1317_s25 + $0x48] sm:$0xff] %v696_v52 }
  0xc2   : > { %761 = vst [vmem:[%s1317_s25 + $0x50] sm:$0xff] %v697_v55 }
  0xc5   : > { %v530_v56 = vpop.f32.mrf.mxu2 }
  0xc6   : > { %v619_v57 = vpop.f32.mrf.mxu3  ;;  %v355_v60 = vpop.f32.mrf.mxu0 }
  0xc7   : > { %v698_v59 = vpack.c.bf16 %v619_v57, %v530_v56  ;;  %v444_v61 = vpop.f32.mrf.mxu1 }
  0xc8   : > { %v699_v62 = vpack.c.bf16 %v444_v61, %v355_v60 }
  0xc9   : > { %762 = vst [vmem:[%s1317_s25 + $0x58] sm:$0xff] %v698_v59  ;;  %992 = vmatmul.msk.bf16.gmra.mxu0 %vm282_vm0, %v1062_v58 }
  0xca   : > { %763 = vst [vmem:[%s1317_s25 + $0x60] sm:$0xff] %v699_v62  ;;  %1008 = vmatmul.msk.bf16.gmra.mxu1 %vm282_vm0, %v1062_v58  ;;  %1024 = vmatmul.msk.bf16.gmra.mxu2 %vm282_vm0, %v1062_v58 }
  0xcb   : > { %1040 = vmatmul.msk.bf16.gmra.mxu3 %vm282_vm0, %v1062_v58 }
  0xcd   : > { %v533_v63 = vpop.f32.mrf.mxu2 }
  0xce   : > { %v622_v0 = vpop.f32.mrf.mxu3  ;;  %v357_v2 = vpop.f32.mrf.mxu0 }
  0xcf   : > { %v700_v1 = vpack.c.bf16 %v622_v0, %v533_v63  ;;  %v446_v3 = vpop.f32.mrf.mxu1 }
  0xd0   : > { %v701_v4 = vpack.c.bf16 %v446_v3, %v357_v2 }
  0xd1   : > { %764 = vst [vmem:[%s1317_s25 + $0x68] sm:$0xff] %v700_v1 }
  0xd2   : > { %765 = vst [vmem:[%s1317_s25 + $0x70] sm:$0xff] %v701_v4 }
  0xd5   : > { %v535_v5 = vpop.f32.mrf.mxu2 }
  0xd6   : > { %v624_v6 = vpop.f32.mrf.mxu3  ;;  %v360_v9 = vpop.f32.mrf.mxu0 }
  0xd7   : > { %v702_v8 = vpack.c.bf16 %v624_v6, %v535_v5  ;;  %v449_v10 = vpop.f32.mrf.mxu1 }
  0xd8   : > { %v703_v11 = vpack.c.bf16 %v449_v10, %v360_v9 }
  0xd9   : > { %766 = vst [vmem:[%s1317_s25 + $0x78] sm:$0xff] %v702_v8  ;;  %993 = vmatmul.msk.bf16.gmra.mxu0 %vm282_vm0, %v1063_v7 }
  0xda   : > { %767 = vst [vmem:[%s1317_s25 + $0x80] sm:$0xff] %v703_v11  ;;  %1009 = vmatmul.msk.bf16.gmra.mxu1 %vm282_vm0, %v1063_v7  ;;  %1025 = vmatmul.msk.bf16.gmra.mxu2 %vm282_vm0, %v1063_v7 }
  0xdb   : > { %1041 = vmatmul.msk.bf16.gmra.mxu3 %vm282_vm0, %v1063_v7 }
  0xdd   : > { %v538_v12 = vpop.f32.mrf.mxu2 }
  0xde   : > { %v627_v13 = vpop.f32.mrf.mxu3  ;;  %v362_v15 = vpop.f32.mrf.mxu0 }
  0xdf   : > { %v704_v14 = vpack.c.bf16 %v627_v13, %v538_v12  ;;  %v451_v16 = vpop.f32.mrf.mxu1 }
  0xe0   : > { %v705_v17 = vpack.c.bf16 %v451_v16, %v362_v15 }
  0xe1   : > { %768 = vst [vmem:[%s1317_s25 + $0x88] sm:$0xff] %v704_v14 }
  0xe2   : > { %769 = vst [vmem:[%s1317_s25 + $0x90] sm:$0xff] %v705_v17 }
  0xe5   : > { %v540_v18 = vpop.f32.mrf.mxu2 }
  0xe6   : > { %v629_v19 = vpop.f32.mrf.mxu3  ;;  %v365_v22 = vpop.f32.mrf.mxu0 }
  0xe7   : > { %v706_v21 = vpack.c.bf16 %v629_v19, %v540_v18  ;;  %v454_v23 = vpop.f32.mrf.mxu1 }
  0xe8   : > { %v707_v24 = vpack.c.bf16 %v454_v23, %v365_v22 }
  0xe9   : > { %770 = vst [vmem:[%s1317_s25 + $0x98] sm:$0xff] %v706_v21  ;;  %994 = vmatmul.msk.bf16.gmra.mxu0 %vm282_vm0, %v1064_v20 }
  0xea   : > { %771 = vst [vmem:[%s1317_s25 + $0xa0] sm:$0xff] %v707_v24  ;;  %1010 = vmatmul.msk.bf16.gmra.mxu1 %vm282_vm0, %v1064_v20  ;;  %1026 = vmatmul.msk.bf16.gmra.mxu2 %vm282_vm0, %v1064_v20 }
  0xeb   : > { %1042 = vmatmul.msk.bf16.gmra.mxu3 %vm282_vm0, %v1064_v20 }
  0xed   : > { %v543_v25 = vpop.f32.mrf.mxu2 }
  0xee   : > { %v632_v26 = vpop.f32.mrf.mxu3  ;;  %v367_v28 = vpop.f32.mrf.mxu0 }
  0xef   : > { %v708_v27 = vpack.c.bf16 %v632_v26, %v543_v25  ;;  %v456_v29 = vpop.f32.mrf.mxu1 }
  0xf0   : > { %v709_v30 = vpack.c.bf16 %v456_v29, %v367_v28 }
  0xf1   : > { %772 = vst [vmem:[%s1317_s25 + $0xa8] sm:$0xff] %v708_v27 }
  0xf2   : > { %773 = vst [vmem:[%s1317_s25 + $0xb0] sm:$0xff] %v709_v30 }
  0xf5   : > { %v545_v31 = vpop.f32.mrf.mxu2 }
  0xf6   : > { %v634_v32 = vpop.f32.mrf.mxu3  ;;  %v370_v35 = vpop.f32.mrf.mxu0 }
  0xf7   : > { %v710_v34 = vpack.c.bf16 %v634_v32, %v545_v31  ;;  %v459_v36 = vpop.f32.mrf.mxu1 }
  0xf8   : > { %v711_v37 = vpack.c.bf16 %v459_v36, %v370_v35 }
  0xf9   : > { %774 = vst [vmem:[%s1317_s25 + $0xb8] sm:$0xff] %v710_v34  ;;  %995 = vmatmul.msk.bf16.gmra.mxu0 %vm282_vm0, %v1065_v33 }
  0xfa   : > { %775 = vst [vmem:[%s1317_s25 + $0xc0] sm:$0xff] %v711_v37  ;;  %1011 = vmatmul.msk.bf16.gmra.mxu1 %vm282_vm0, %v1065_v33  ;;  %1027 = vmatmul.msk.bf16.gmra.mxu2 %vm282_vm0, %v1065_v33 }
  0xfb   : > { %1043 = vmatmul.msk.bf16.gmra.mxu3 %vm282_vm0, %v1065_v33 }
  0xfd   : > { %v548_v38 = vpop.f32.mrf.mxu2 }
  0xfe   : > { %v637_v39 = vpop.f32.mrf.mxu3  ;;  %v372_v41 = vpop.f32.mrf.mxu0 }
  0xff   : > { %v712_v40 = vpack.c.bf16 %v637_v39, %v548_v38  ;;  %v461_v42 = vpop.f32.mrf.mxu1 }
 0x100   : > { %v713_v43 = vpack.c.bf16 %v461_v42, %v372_v41 }
 0x101   : > { %776 = vst [vmem:[%s1317_s25 + $0xc8] sm:$0xff] %v712_v40 }
 0x102   : > { %777 = vst [vmem:[%s1317_s25 + $0xd0] sm:$0xff] %v713_v43 }
 0x105   : > { %v550_v44 = vpop.f32.mrf.mxu2 }
 0x106   : > { %v639_v45 = vpop.f32.mrf.mxu3  ;;  %v375_v48 = vpop.f32.mrf.mxu0 }
 0x107   : > { %v714_v47 = vpack.c.bf16 %v639_v45, %v550_v44  ;;  %v464_v49 = vpop.f32.mrf.mxu1 }
 0x108   : > { %v715_v50 = vpack.c.bf16 %v464_v49, %v375_v48 }
 0x109   : > { %778 = vst [vmem:[%s1317_s25 + $0xd8] sm:$0xff] %v714_v47  ;;  %996 = vmatmul.msk.bf16.gmra.mxu0 %vm282_vm0, %v1066_v46 }
 0x10a   : > { %779 = vst [vmem:[%s1317_s25 + $0xe0] sm:$0xff] %v715_v50  ;;  %1012 = vmatmul.msk.bf16.gmra.mxu1 %vm282_vm0, %v1066_v46  ;;  %1028 = vmatmul.msk.bf16.gmra.mxu2 %vm282_vm0, %v1066_v46 }
 0x10b   : > { %1044 = vmatmul.msk.bf16.gmra.mxu3 %vm282_vm0, %v1066_v46 }
 0x10d   : > { %v553_v51 = vpop.f32.mrf.mxu2 }
 0x10e   : > { %v642_v52 = vpop.f32.mrf.mxu3  ;;  %v377_v54 = vpop.f32.mrf.mxu0 }
 0x10f   : > { %v716_v53 = vpack.c.bf16 %v642_v52, %v553_v51  ;;  %v466_v55 = vpop.f32.mrf.mxu1 }
 0x110   : > { %v717_v56 = vpack.c.bf16 %v466_v55, %v377_v54 }
 0x111   : > { %780 = vst [vmem:[%s1317_s25 + $0xe8] sm:$0xff] %v716_v53 }
 0x112   : > { %781 = vst [vmem:[%s1317_s25 + $0xf0] sm:$0xff] %v717_v56 }
 0x115   : > { %v555_v57 = vpop.f32.mrf.mxu2 }
 0x116   : > { %v644_v58 = vpop.f32.mrf.mxu3  ;;  %v380_v60 = vpop.f32.mrf.mxu0 }
 0x117   : > { %v718_v59 = vpack.c.bf16 %v644_v58, %v555_v57  ;;  %v469_v61 = vpop.f32.mrf.mxu1 }
 0x118   : > { %v719_v62 = vpack.c.bf16 %v469_v61, %v380_v60 }
 0x119   : > { %782 = vst [vmem:[%s1317_s25 + $0xf8] sm:$0xff] %v718_v59 }
 0x11a   : > { %783 = vst [vmem:[%s1317_s25 + $0x100] sm:$0xff] %v719_v62 }
 0x11d   : > { %v558_v63 = vpop.f32.mrf.mxu2 }
 0x11e   : > { %v647_v0 = vpop.f32.mrf.mxu3  ;;  %v382_v2 = vpop.f32.mrf.mxu0 }
 0x11f   : > { %v720_v1 = vpack.c.bf16 %v647_v0, %v558_v63  ;;  %v471_v3 = vpop.f32.mrf.mxu1 }
 0x120   : > { %v721_v4 = vpack.c.bf16 %v471_v3, %v382_v2 }
 0x121   : > { %784 = vst [vmem:[%s1317_s25 + $0x108] sm:$0xff] %v720_v1 }
 0x122   : > { %785 = vst [vmem:[%s1317_s25 + $0x110] sm:$0xff] %v721_v4 }
 0x125   : > { %v560_v5 = vpop.f32.mrf.mxu2 }
 0x126   : > { %v649_v6 = vpop.f32.mrf.mxu3  ;;  %v385_v8 = vpop.f32.mrf.mxu0 }
 0x127   : > { %v722_v7 = vpack.c.bf16 %v649_v6, %v560_v5  ;;  %v474_v9 = vpop.f32.mrf.mxu1 }
 0x128   : > { %v723_v10 = vpack.c.bf16 %v474_v9, %v385_v8 }
 0x129   : > { %786 = vst [vmem:[%s1317_s25 + $0x118] sm:$0xff] %v722_v7 }
 0x12a   : > { %787 = vst [vmem:[%s1317_s25 + $0x120] sm:$0xff] %v723_v10 }
 0x12d   : > { %v563_v11 = vpop.f32.mrf.mxu2 }
 0x12e   : > { %v652_v12 = vpop.f32.mrf.mxu3  ;;  %v387_v14 = vpop.f32.mrf.mxu0 }
 0x12f   : > { %v724_v13 = vpack.c.bf16 %v652_v12, %v563_v11  ;;  %v476_v15 = vpop.f32.mrf.mxu1 }
 0x130   : > { %v725_v16 = vpack.c.bf16 %v476_v15, %v387_v14 }
 0x131   : > { %788 = vst [vmem:[%s1317_s25 + $0x128] sm:$0xff] %v724_v13 }
 0x132   : > { %789 = vst [vmem:[%s1317_s25 + $0x130] sm:$0xff] %v725_v16 }
 0x135   : > { %v565_v17 = vpop.f32.mrf.mxu2 }
 0x136   : > { %v654_v18 = vpop.f32.mrf.mxu3  ;;  %v390_v20 = vpop.f32.mrf.mxu0 }
 0x137   : > { %v726_v19 = vpack.c.bf16 %v654_v18, %v565_v17  ;;  %v479_v21 = vpop.f32.mrf.mxu1 }
 0x138   : > { %v727_v22 = vpack.c.bf16 %v479_v21, %v390_v20 }
 0x139   : > { %790 = vst [vmem:[%s1317_s25 + $0x138] sm:$0xff] %v726_v19 }
 0x13a   : > { %791 = vst [vmem:[%s1317_s25 + $0x140] sm:$0xff] %v727_v22 }
 0x13d   : > { %v568_v23 = vpop.f32.mrf.mxu2 }
 0x13e   : > { %v657_v24 = vpop.f32.mrf.mxu3  ;;  %v392_v26 = vpop.f32.mrf.mxu0 }
 0x13f   : > { %v728_v25 = vpack.c.bf16 %v657_v24, %v568_v23  ;;  %v481_v27 = vpop.f32.mrf.mxu1 }
 0x140   : > { %v729_v28 = vpack.c.bf16 %v481_v27, %v392_v26 }
 0x141   : > { %792 = vst [vmem:[%s1317_s25 + $0x148] sm:$0xff] %v728_v25 }
 0x142   : > { %793 = vst [vmem:[%s1317_s25 + $0x150] sm:$0xff] %v729_v28 }
 0x145   : > { %v570_v29 = vpop.f32.mrf.mxu2 }
 0x146   : > { %v659_v30 = vpop.f32.mrf.mxu3  ;;  %v395_v32 = vpop.f32.mrf.mxu0 }
 0x147   : > { %v730_v31 = vpack.c.bf16 %v659_v30, %v570_v29  ;;  %v484_v33 = vpop.f32.mrf.mxu1 }
 0x148   : > { %v731_v34 = vpack.c.bf16 %v484_v33, %v395_v32 }
 0x149   : > { %794 = vst [vmem:[%s1317_s25 + $0x158] sm:$0xff] %v730_v31 }
 0x14a   : > { %795 = vst [vmem:[%s1317_s25 + $0x160] sm:$0xff] %v731_v34 }
 0x14d   : > { %v573_v35 = vpop.f32.mrf.mxu2 }
 0x14e   : > { %v662_v36 = vpop.f32.mrf.mxu3  ;;  %v397_v38 = vpop.f32.mrf.mxu0 }
 0x14f   : > { %v732_v37 = vpack.c.bf16 %v662_v36, %v573_v35  ;;  %v486_v39 = vpop.f32.mrf.mxu1 }
 0x150   : > { %v733_v40 = vpack.c.bf16 %v486_v39, %v397_v38 }
 0x151   : > { %796 = vst [vmem:[%s1317_s25 + $0x168] sm:$0xff] %v732_v37 }
 0x152   : > { %797 = vst [vmem:[%s1317_s25 + $0x170] sm:$0xff] %v733_v40 }
 0x155   : > { %v575_v41 = vpop.f32.mrf.mxu2 }
 0x156   : > { %v664_v42 = vpop.f32.mrf.mxu3  ;;  %v400_v44 = vpop.f32.mrf.mxu0 }
 0x157   : > { %v734_v43 = vpack.c.bf16 %v664_v42, %v575_v41  ;;  %v489_v45 = vpop.f32.mrf.mxu1 }
 0x158   : > { %v735_v46 = vpack.c.bf16 %v489_v45, %v400_v44 }
 0x159   : > { %798 = vst [vmem:[%s1317_s25 + $0x178] sm:$0xff] %v734_v43 }
 0x15a   : > { %799 = vst [vmem:[%s1317_s25 + $0x180] sm:$0xff] %v735_v46 }
 0x15d   : > { %v578_v47 = vpop.f32.mrf.mxu2 }
 0x15e   : > { %v667_v48 = vpop.f32.mrf.mxu3  ;;  %v402_v50 = vpop.f32.mrf.mxu0 }
 0x15f   : > { %v736_v49 = vpack.c.bf16 %v667_v48, %v578_v47  ;;  %v491_v51 = vpop.f32.mrf.mxu1 }
 0x160   : > { %v737_v52 = vpack.c.bf16 %v491_v51, %v402_v50 }
 0x161   : > { %800 = vst [vmem:[%s1317_s25 + $0x188] sm:$0xff] %v736_v49 }
 0x162   : > { %801 = vst [vmem:[%s1317_s25 + $0x190] sm:$0xff] %v737_v52 }
 0x165   : > { %v580_v53 = vpop.f32.mrf.mxu2 }
 0x166   : > { %v669_v54 = vpop.f32.mrf.mxu3  ;;  %v405_v56 = vpop.f32.mrf.mxu0 }
 0x167   : > { %v738_v55 = vpack.c.bf16 %v669_v54, %v580_v53  ;;  %v494_v57 = vpop.f32.mrf.mxu1 }
 0x168   : > { %v739_v58 = vpack.c.bf16 %v494_v57, %v405_v56 }
 0x169   : > { %802 = vst [vmem:[%s1317_s25 + $0x198] sm:$0xff] %v738_v55 }
 0x16a   : > { %803 = vst [vmem:[%s1317_s25 + $0x1a0] sm:$0xff] %v739_v58 }
 0x16d   : > { %v583_v59 = vpop.f32.mrf.mxu2 }
 0x16e   : > { %v672_v60 = vpop.f32.mrf.mxu3  ;;  %v407_v62 = vpop.f32.mrf.mxu0 }
 0x16f   : > { %v740_v61 = vpack.c.bf16 %v672_v60, %v583_v59  ;;  %v496_v63 = vpop.f32.mrf.mxu1 }
 0x170   : > { %v741_v0 = vpack.c.bf16 %v496_v63, %v407_v62 }
 0x171   : > { %804 = vst [vmem:[%s1317_s25 + $0x1a8] sm:$0xff] %v740_v61 }
 0x172   : > { %805 = vst [vmem:[%s1317_s25 + $0x1b0] sm:$0xff] %v741_v0 }
 0x175   : > { %v585_v1 = vpop.f32.mrf.mxu2 }
 0x176   : > { %v674_v2 = vpop.f32.mrf.mxu3  ;;  %v410_v4 = vpop.f32.mrf.mxu0 }
 0x177   : > { %v742_v3 = vpack.c.bf16 %v674_v2, %v585_v1  ;;  %v499_v5 = vpop.f32.mrf.mxu1 }
 0x178   : > { %v743_v6 = vpack.c.bf16 %v499_v5, %v410_v4 }
 0x179   : > { %806 = vst [vmem:[%s1317_s25 + $0x1b8] sm:$0xff] %v742_v3 }
 0x17a   : > { %807 = vst [vmem:[%s1317_s25 + $0x1c0] sm:$0xff] %v743_v6 }
 0x17d   : > { %v588_v7 = vpop.f32.mrf.mxu2 }
 0x17e   : > { %v677_v8 = vpop.f32.mrf.mxu3  ;;  %v412_v10 = vpop.f32.mrf.mxu0 }
 0x17f   : > { %v744_v9 = vpack.c.bf16 %v677_v8, %v588_v7  ;;  %v501_v11 = vpop.f32.mrf.mxu1 }
 0x180   : > { %v745_v12 = vpack.c.bf16 %v501_v11, %v412_v10 }
 0x181   : > { %808 = vst [vmem:[%s1317_s25 + $0x1c8] sm:$0xff] %v744_v9 }
 0x182   : > { %809 = vst [vmem:[%s1317_s25 + $0x1d0] sm:$0xff] %v745_v12 }
 0x185   : > { %v590_v13 = vpop.f32.mrf.mxu2 }
 0x186   : > { %v679_v14 = vpop.f32.mrf.mxu3  ;;  %v415_v16 = vpop.f32.mrf.mxu0 }
 0x187   : > { %v746_v15 = vpack.c.bf16 %v679_v14, %v590_v13  ;;  %v504_v17 = vpop.f32.mrf.mxu1 }
 0x188   : > { %v747_v18 = vpack.c.bf16 %v504_v17, %v415_v16 }
 0x189   : > { %810 = vst [vmem:[%s1317_s25 + $0x1d8] sm:$0xff] %v746_v15 }
 0x18a   : > { %811 = vst [vmem:[%s1317_s25 + $0x1e0] sm:$0xff] %v747_v18 }
 0x18d   : > { %v593_v19 = vpop.f32.mrf.mxu2 }
 0x18e   : > { %v682_v20 = vpop.f32.mrf.mxu3  ;;  %v417_v22 = vpop.f32.mrf.mxu0 }
 0x18f   : > { %v748_v21 = vpack.c.bf16 %v682_v20, %v593_v19  ;;  %v506_v23 = vpop.f32.mrf.mxu1 }
 0x190   : > { %v749_v24 = vpack.c.bf16 %v506_v23, %v417_v22 }
 0x191   : > { %812 = vst [vmem:[%s1317_s25 + $0x1e8] sm:$0xff] %v748_v21 }
 0x192   : > { %813 = vst [vmem:[%s1317_s25 + $0x1f0] sm:$0xff] %v749_v24 }
 0x195   : > { %v595_v25 = vpop.f32.mrf.mxu2 }
 0x196   : > { %v684_v26 = vpop.f32.mrf.mxu3 }
 0x197   : > { %v750_v27 = vpack.c.bf16 %v684_v26, %v595_v25 }
 0x199   : > { %814 = vst [vmem:[%s1317_s25 + $0x1f8] sm:$0xff] %v750_v27 }
 0x19a   : > { %1141 = shalt.err (!%p1138_p3)
}
 0x19b   : > { %s1178_s17 = smov 256   ;;  %s1179_s21 = smov 16  }
 0x19c   : > { %1073 = dma.vmem_to_hbm [thread:$0]  (%p1233_p5), %s830_s30, 8192, %s832_s3, %s816_s13, %s1178_s17, %s1178_s17, %s1179_s21  }
 0x19d PF: > { %p1079_p4 = scmp.ge.s32.totalorder %s1176_s12, 2  ;;  %s846_s22 = sand.u32 1, %s1164_s9  }
 0x19e   : > { %s847_s23 = scalar_lea.sflag [#allocation3], %s846_s22 }
 0x19f   : > { %p1076_p7 = pnand %p1079_p4, %p1237_p6 }
 0x1a1   : > { %p1077_p8 = pneg %p1076_p7 }
 0x1a3   : > { %1159 = dma.done.wait (%p1077_p8), %s847_s23, 8192  }
 0x1a4   : > { %1161 = vsyncadd (%p1077_p8), %s847_s23, 4294959104  ;;  %p12_p9 = scmp.ge.s32.totalorder %s1220_s15, 4   ;;  %s1461_s9 = smov %s1168_s10 }
 0x1a5   : > { %s1462_s10 = smov %s1172_s11  ;;  %s1463_s11 = smov %s1231_s18 }
 0x1a6   : > { %s1464_s12 = smov %s1220_s15  ;;  %14 = sbr.rel (!%p12_p9) target bundleno = 3 (0x3), region = 63 }
 0x1ab   :  { %853 = vsyncpa [#allocation3], 1 }
 0x1ac   :  { %855 = vsyncpa [#allocation3 + $0x1], 1 }

</bundles_post_ra>
